<compile_context>
chip_gen: v7x
topology: tpu7x:2x2x1
jax: 0.10.0
libtpu: 0.0.40
codegen_flags: <defaults>
</compile_context>

<pallas_src>
import jax
import jax.numpy as jnp
from jax.experimental import pallas as pl
from jax.experimental.pallas import tpu as pltpu

KSIZE = 7
PAD = KSIZE // 2


def _attention_gate_kernel(x_ref, a_ref, b_ref, o_ref):
    # x_ref : (NB, C, HW)   lane-dense batch block
    # a_ref : (2, HW, HW)   folded conv+BN operators (channel-max / channel-mean)
    # b_ref : (1,)          folded BN bias (SMEM scalar)
    # o_ref : (NB, C, HW)
    c = x_ref.shape[1]

    xb = x_ref[...].astype(jnp.float32)                 # (NB, C, HW)

    # ----- ZPool: channel max / channel mean (whole-block reductions) -----
    zmax = jnp.max(xb, axis=1)                          # (NB, HW)
    zmean = jnp.sum(xb, axis=1) * (1.0 / c)             # (NB, HW)

    # ----- 7x7 same conv (2 -> 1 ch) + folded BN: two MXU matmuls in the flat domain -----
    y = jnp.dot(zmax, a_ref[0], preferred_element_type=jnp.float32)
    y = y + jnp.dot(zmean, a_ref[1], preferred_element_type=jnp.float32)
    y = y + b_ref[0]                                    # scalar SMEM bias

    # ----- sigmoid gate (exp + reciprocal both on the EUP) -----
    scale = pl.reciprocal(1.0 + jnp.exp(-y), approx=True)        # (NB, HW)

    # ----- apply the gate: one lane-dense full-block store -----
    o_ref[...] = (x_ref[...].astype(jnp.float32) * scale[:, None, :]).astype(o_ref.dtype)


@jax.jit
def attention_gate(x, conv_w, gamma, beta, running_mean, running_var, eps=1e-5):
    """AttentionGate forward (inference-mode BatchNorm).

    x:            (N, C, H, W)
    conv_w:       (1, 2, 7, 7)   Conv2d(2, 1, 7, padding=3, bias=False) weight
    gamma/beta/running_mean/running_var: (1,) BatchNorm2d(1) parameters / running stats
    """
    n, c, h, w = x.shape
    k = KSIZE
    hw = h * w

    # ---------- weight-only preprocessing (no dependence on x) ----------
    # Fold BatchNorm2d (eval): y_bn = conv(z) * s + (beta - mean * s)
    bn_scale = gamma / jnp.sqrt(running_var + eps)                  # (1,)
    w_fold = (conv_w[0] * bn_scale[0]).astype(jnp.float32)          # (2, K, K)
    bias = (beta - running_mean * bn_scale).astype(jnp.float32)     # (1,)

    # Flattened-domain conv operator:
    #   out_flat[p] = sum_i zmax_flat[i]*A[0,i,p] + zmean_flat[i]*A[1,i,p]
    #   A[ch, i, p] = w_fold[ch, iy-py+PAD, ix-px+PAD]  if the kernel index is in range, else 0
    pos = jnp.arange(hw)
    ry, rx = pos // w, pos % w
    ky = ry[:, None] - ry[None, :] + PAD                            # (HW, HW)
    kx = rx[:, None] - rx[None, :] + PAD
    valid = (ky >= 0) & (ky < k) & (kx >= 0) & (kx < k)
    a_mats = jnp.where(valid[None],
                       w_fold[:, jnp.clip(ky, 0, k - 1), jnp.clip(kx, 0, k - 1)],
                       0.0).astype(jnp.float32)                     # (2, HW, HW)

    # ---------- lane-dense layout & batch blocking ----------
    x_flat = x.reshape(n, c, hw)
    per_sample = c * hw * x.dtype.itemsize
    nb = 1
    for d in range(1, n + 1):
        # biggest batch block <= ~1 MiB, while keeping >=2 grid steps when N >= 2 (v7x dual-TC)
        if n % d == 0 and d * per_sample <= (1 << 20) and (n // d) >= min(2, n):
            nb = d
    grid = (n // nb,)

    # Double-buffered in + out blocks + the conv operator (+ slack); raise the VMEM cap only
    # when the default 32 MiB scoped limit would be exceeded (cap at 64 MiB for v7x).
    est_vmem = 4 * nb * per_sample + a_mats.size * 4 + (1 << 20)
    extra_params = {}
    if est_vmem > (32 << 20):
        extra_params["vmem_limit_bytes"] = int(min(est_vmem, 64 << 20))

    out = pl.pallas_call(
        _attention_gate_kernel,
        out_shape=jax.ShapeDtypeStruct((n, c, hw), x.dtype),
        grid_spec=pltpu.PrefetchScalarGridSpec(
            num_scalar_prefetch=0,
            grid=grid,
            in_specs=[
                pl.BlockSpec((nb, c, hw), lambda i: (i, 0, 0)),      # x batch block
                pl.BlockSpec((2, hw, hw), lambda i: (0, 0, 0)),      # conv operator (broadcast)
                pl.BlockSpec(memory_space=pltpu.MemorySpace.SMEM),   # folded BN bias (scalar)
            ],
            out_specs=pl.BlockSpec((nb, c, hw), lambda i: (i, 0, 0)),
        ),
        compiler_params=pltpu.CompilerParams(
            dimension_semantics=("parallel",), **extra_params),
    )(x_flat, a_mats, bias)

    return out.reshape(n, c, h, w)


if __name__ == "__main__":
    key = jax.random.PRNGKey(0)
    kx_, kw_, kg_, kb_, km_, kv_ = jax.random.split(key, 6)

    N, C, H, W = 2, 4, 16, 16
    x = jax.random.normal(kx_, (N, C, H, W), dtype=jnp.float32)

    fan_in = 2 * KSIZE * KSIZE
    bound = 1.0 / (fan_in ** 0.5)
    conv_w = jax.random.uniform(kw_, (1, 2, KSIZE, KSIZE), jnp.float32, -bound, bound)
    gamma = 1.0 + 0.1 * jax.random.normal(kg_, (1,), jnp.float32)
    beta = 0.1 * jax.random.normal(kb_, (1,), jnp.float32)
    running_mean = 0.1 * jax.random.normal(km_, (1,), jnp.float32)
    running_var = 1.0 + 0.25 * jax.random.uniform(kv_, (1,), jnp.float32)

    y = attention_gate(x, conv_w, gamma, beta, running_mean, running_var)
    y = jax.block_until_ready(y)

    # ---------- pure-JAX reference of the PyTorch forward ----------
    zc = jnp.concatenate(
        [jnp.max(x, axis=1, keepdims=True), jnp.mean(x, axis=1, keepdims=True)], axis=1)
    conv_out = jax.lax.conv_general_dilated(
        zc, conv_w, window_strides=(1, 1), padding=((PAD, PAD), (PAD, PAD)),
        dimension_numbers=("NCHW", "OIHW", "NCHW"),
        precision=jax.lax.Precision.HIGHEST)
    s = (gamma / jnp.sqrt(running_var + 1e-5)).reshape(1, 1, 1, 1)
    bn = (conv_out - running_mean.reshape(1, 1, 1, 1)) * s + beta.reshape(1, 1, 1, 1)
    y_ref = x * jax.nn.sigmoid(bn)

    assert y.shape == x.shape and y.dtype == x.dtype
    err = float(jnp.max(jnp.abs(y - y_ref)))
    assert err < 2e-2, f"max abs error too large: {err}"
    print("KERNEL_OK")
</pallas_src>

<mosaic_0001>
module attributes {stable_mosaic.version = 11 : i64} {
  func.func @_attention_gate_kernel(%arg0: i32, %arg1: memref<1x4x256xf32, #tpu.memory_space<vmem>>, %arg2: memref<2x256x256xf32, #tpu.memory_space<vmem>>, %arg3: memref<1xf32, #tpu.memory_space<smem>>, %arg4: memref<1x4x256xf32, #tpu.memory_space<vmem>>) attributes {dimension_semantics = [#tpu.dimension_semantics<parallel>], iteration_bounds = array<i64: 2>, scalar_prefetch = 0 : i64, scratch_operands = 0 : i64, tpu.core_type = #tpu.core_type<tc>, window_params = [{transform_indices = @transform_0, window_bounds = array<i64: 1, 4, 256>}, {pipeline_mode = #tpu.pipeline_mode<synchronous>, transform_indices = @transform_1, window_bounds = array<i64: 2, 256, 256>}, {transform_indices = @transform_2, window_bounds = array<i64: 1>}, {transform_indices = @transform_3, window_bounds = array<i64: 1, 4, 256>}]} {
    %c0 = arith.constant 0 : index
    %c0_0 = arith.constant 0 : index
    %c0_1 = arith.constant 0 : index
    %0 = vector.load %arg1[%c0, %c0_0, %c0_1] : memref<1x4x256xf32, #tpu.memory_space<vmem>>, vector<1x4x256xf32>
    %cst = arith.constant dense<0xFF800000> : vector<1x256xf32>
    %1 = vector.multi_reduction <maximumf>, %0, %cst [1] : vector<1x4x256xf32> to vector<1x256xf32>
    %cst_2 = arith.constant dense<0.000000e+00> : vector<1x256xf32>
    %2 = vector.multi_reduction <add>, %0, %cst_2 [1] : vector<1x4x256xf32> to vector<1x256xf32>
    %cst_3 = arith.constant 2.500000e-01 : f32
    %3 = vector.broadcast %cst_3 : f32 to vector<1x256xf32>
    %4 = arith.mulf %2, %3 : vector<1x256xf32>
    %c0_4 = arith.constant 0 : index
    %c0_5 = arith.constant 0 : index
    %c0_6 = arith.constant 0 : index
    %5 = vector.load %arg2[%c0_4, %c0_5, %c0_6] : memref<2x256x256xf32, #tpu.memory_space<vmem>>, vector<1x256x256xf32>
    %6 = vector.shape_cast %5 : vector<1x256x256xf32> to vector<256x256xf32>
    %cst_7 = arith.constant dense<0.000000e+00> : vector<1x256xf32>
    %7 = tpu.matmul %1, %6, %cst_7 {dimension_numbers = #tpu.dot_dimension_numbers<[1], [0], [0], [1], [0, 0, 1, 1], [], []>} : vector<1x256xf32>, vector<256x256xf32>, vector<1x256xf32> -> vector<1x256xf32>
    %c1 = arith.constant 1 : index
    %c0_8 = arith.constant 0 : index
    %c0_9 = arith.constant 0 : index
    %8 = vector.load %arg2[%c1, %c0_8, %c0_9] : memref<2x256x256xf32, #tpu.memory_space<vmem>>, vector<1x256x256xf32>
    %9 = vector.shape_cast %8 : vector<1x256x256xf32> to vector<256x256xf32>
    %cst_10 = arith.constant dense<0.000000e+00> : vector<1x256xf32>
    %10 = tpu.matmul %4, %9, %cst_10 {dimension_numbers = #tpu.dot_dimension_numbers<[1], [0], [0], [1], [0, 0, 1, 1], [], []>} : vector<1x256xf32>, vector<256x256xf32>, vector<1x256xf32> -> vector<1x256xf32>
    %11 = arith.addf %7, %10 : vector<1x256xf32>
    %c0_11 = arith.constant 0 : index
    %12 = memref.load %arg3[%c0_11] : memref<1xf32, #tpu.memory_space<smem>>
    %13 = vector.broadcast %12 : f32 to vector<1x256xf32>
    %14 = arith.addf %11, %13 : vector<1x256xf32>
    %cst_12 = arith.constant 0.000000e+00 : f32
    %15 = vector.broadcast %cst_12 : f32 to vector<1x256xf32>
    %16 = arith.subf %15, %14 : vector<1x256xf32>
    %17 = math.exp %16 : vector<1x256xf32>
    %cst_13 = arith.constant 1.000000e+00 : f32
    %18 = vector.broadcast %cst_13 : f32 to vector<1x256xf32>
    %19 = arith.addf %18, %17 : vector<1x256xf32>
    %20 = tpu.reciprocal %19 {approx = true} : vector<1x256xf32> -> vector<1x256xf32>
    %c0_14 = arith.constant 0 : index
    %c0_15 = arith.constant 0 : index
    %c0_16 = arith.constant 0 : index
    %21 = vector.load %arg1[%c0_14, %c0_15, %c0_16] : memref<1x4x256xf32, #tpu.memory_space<vmem>>, vector<1x4x256xf32>
    %22 = vector.shape_cast %20 : vector<1x256xf32> to vector<1x1x256xf32>
    %23 = vector.broadcast %22 : vector<1x1x256xf32> to vector<1x4x256xf32>
    %24 = arith.mulf %21, %23 : vector<1x4x256xf32>
    %c0_17 = arith.constant 0 : index
    %c0_18 = arith.constant 0 : index
    %c0_19 = arith.constant 0 : index
    %25 = vector.load %arg4[%c0_17, %c0_18, %c0_19] : memref<1x4x256xf32, #tpu.memory_space<vmem>>, vector<1x4x256xf32>
    tpu.vector_store %arg4[%c0_17, %c0_18, %c0_19], %24 {strides = array<i32>} : memref<1x4x256xf32, #tpu.memory_space<vmem>>, vector<1x4x256xf32>,
    return
  }
  func.func @transform_0(%arg0: i32) -> (i32, i32, i32) {
    %c0_i32 = arith.constant 0 : i32
    %c0_i32_0 = arith.constant 0 : i32
    %c0_i32_1 = arith.constant 0 : i32
    return %arg0, %c0_i32, %c0_i32_0 : i32, i32, i32
  }
  func.func @transform_1(%arg0: i32) -> (i32, i32, i32) {
    %c0_i32 = arith.constant 0 : i32
    %c0_i32_0 = arith.constant 0 : i32
    %c0_i32_1 = arith.constant 0 : i32
    %c0_i32_2 = arith.constant 0 : i32
    return %c0_i32, %c0_i32_0, %c0_i32_1 : i32, i32, i32
  }
  func.func @transform_2(%arg0: i32) -> i32 {
    %c0_i32 = arith.constant 0 : i32
    %c0_i32_0 = arith.constant 0 : i32
    return %c0_i32 : i32
  }
  func.func @transform_3(%arg0: i32) -> (i32, i32, i32) {
    %c0_i32 = arith.constant 0 : i32
    %c0_i32_0 = arith.constant 0 : i32
    %c0_i32_1 = arith.constant 0 : i32
    return %arg0, %c0_i32, %c0_i32_0 : i32, i32, i32
  }
}

</mosaic_0001>

<bundles_post_ra>
// kernel: attention_gate.1
= control target key start
LH: loop header
LB: loop body
LE: loop exit
PB: predicated region body
PF: predicated region fallthrough
CT: control target
= control target key end

     0   :  { %s816_s14 = smov 0   ;;  %s1245_s0 = inlined_call_operand.vmem [shape: f32[2,4,256], index: 0, kind: input, shape index: {}]   ;;  %s1246_s1 = inlined_call_operand.vmem [shape: f32[2,256,256], index: 1, kind: input, shape index: {}]   ;;  %s1247_s2 = inlined_call_operand.<no memory space> [shape: f32[1], index: 2, kind: input, shape index: {}]   ;;  %s1248_s3 = inlined_call_operand.vmem [shape: f32[2,4,256], index: 3, kind: output, shape index: {}]  }
   0x1   :  { %8 = sst [smem:[#allocation2]] %s1247_s2 }
   0x2 LB: > { %s561_s15 = sadd.s32 4294967295, %s791_s14   ;;  %p565_p0 = scmp.ge.s32.totalorder %s791_s14, 1  ;;  %s791_s14 = sphi %s816_s14, %s14_s14  }
   0x3   : > { %p138_p1 = scmp.lt.s32.totalorder %s791_s14, 3 }
   0x5   : > { %p139_p2 = pnand %p565_p0, %p138_p1 }
   0x6   : > { %v571_v0 = vld [vmem:[%s1246_s1 + $0x208] sm:$0xff] (!%p139_p2)  ;;  %v573_v1 = vld [vmem:[%s1246_s1 + $0x218] sm:$0xff] (!%p139_p2)  ;;  %v570_v5 = vld [vmem:[%s1246_s1 + $0x200] sm:$0xff] (!%p139_p2)  ;;  %p1030_p3 = scmp.lt.s32.totalorder (!%p139_p2), %s561_s15, 1  ;;  %vm176_vm0 = vcmask (!%p139_p2), 1043456   ;;  %s478_s19 = sld [smem:[#allocation2]] (!%p139_p2) }
   0x7   : > { %142 = sbr.rel (%p139_p2) target bundleno = 326 (0x146), region = 32  ;;  %v208_v2 = vld [vmem:[%s1246_s1 + $0x8] sm:$0xff] (!%p139_p2)  ;;  %v638_v3 = vpack.c.bf16 (!%p139_p2), %v573_v1, %v571_v0  ;;  %v210_v4 = vld [vmem:[%s1246_s1 + $0x18] sm:$0xff] (!%p139_p2)  ;;  %v572_v6 = vld [vmem:[%s1246_s1 + $0x210] sm:$0xff] (!%p139_p2) }
   0x8   : > { %v702_v7 = vpack.c.bf16 (!%p139_p2), %v210_v4, %v208_v2  ;;  %v640_v8 = vpack.c.bf16 (!%p139_p2), %v572_v6, %v570_v5  ;;  %v207_v9 = vld [vmem:[%s1246_s1] sm:$0xff] (!%p139_p2)  ;;  %v209_v10 = vld [vmem:[%s1246_s1 + $0x10] sm:$0xff] (!%p139_p2)  ;;  %v575_v11 = vld [vmem:[%s1246_s1 + $0x228] sm:$0xff] (!%p139_p2) }
   0x9   : > { %639 = vmatprep.subr.bf16.mxu1 (!%p139_p2), %v638_v3  ;;  %v704_v12 = vpack.c.bf16 (!%p139_p2), %v209_v10, %v207_v9  ;;  %v577_v13 = vld [vmem:[%s1246_s1 + $0x238] sm:$0xff] (!%p139_p2)  ;;  %v212_v14 = vld [vmem:[%s1246_s1 + $0x28] sm:$0xff] (!%p139_p2)  ;;  %v574_v18 = vld [vmem:[%s1246_s1 + $0x220] sm:$0xff] (!%p139_p2) }
   0xa   : > { %v214_v15 = vld [vmem:[%s1246_s1 + $0x38] sm:$0xff] (!%p139_p2)  ;;  %703 = vmatprep.subr.bf16.mxu0 (!%p139_p2), %v702_v7  ;;  %641 = vmatpush1.bf16.msra.mxu1 (!%p139_p2), %v640_v8  ;;  %v642_v16 = vpack.c.bf16 (!%p139_p2), %v577_v13, %v575_v11  ;;  %v576_v19 = vld [vmem:[%s1246_s1 + $0x230] sm:$0xff] (!%p139_p2)  ;;  %v211_v20 = vld [vmem:[%s1246_s1 + $0x20] sm:$0xff] (!%p139_p2) }
   0xb   : > { %v706_v17 = vpack.c.bf16 (!%p139_p2), %v214_v15, %v212_v14  ;;  %705 = vmatpush1.bf16.msra.mxu0 (!%p139_p2), %v704_v12  ;;  %v644_v21 = vpack.c.bf16 (!%p139_p2), %v576_v19, %v574_v18  ;;  %v213_v22 = vld [vmem:[%s1246_s1 + $0x30] sm:$0xff] (!%p139_p2)  ;;  %v579_v23 = vld [vmem:[%s1246_s1 + $0x248] sm:$0xff] (!%p139_p2)  ;;  %v581_v24 = vld [vmem:[%s1246_s1 + $0x258] sm:$0xff] (!%p139_p2) }
   0xc   : > { %643 = vmatprep.subr.bf16.mxu1 (!%p139_p2), %v642_v16  ;;  %v708_v25 = vpack.c.bf16 (!%p139_p2), %v213_v22, %v211_v20  ;;  %v646_v26 = vpack.c.bf16 (!%p139_p2), %v581_v24, %v579_v23  ;;  %v216_v27 = vld [vmem:[%s1246_s1 + $0x48] sm:$0xff] (!%p139_p2)  ;;  %v218_v28 = vld [vmem:[%s1246_s1 + $0x58] sm:$0xff] (!%p139_p2)  ;;  %v578_v29 = vld [vmem:[%s1246_s1 + $0x240] sm:$0xff] (!%p139_p2) }
   0xd   : > { %707 = vmatprep.subr.bf16.mxu0 (!%p139_p2), %v706_v17  ;;  %v710_v30 = vpack.c.bf16 (!%p139_p2), %v218_v28, %v216_v27  ;;  %v580_v31 = vld [vmem:[%s1246_s1 + $0x250] sm:$0xff] (!%p139_p2)  ;;  %v215_v32 = vld [vmem:[%s1246_s1 + $0x40] sm:$0xff] (!%p139_p2)  ;;  %v583_v35 = vld [vmem:[%s1246_s1 + $0x268] sm:$0xff] (!%p139_p2) }
   0xe   : > { %v217_v33 = vld [vmem:[%s1246_s1 + $0x50] sm:$0xff]  ;;  %645 = vmatpush1.bf16.msra.mxu1 %v644_v21  ;;  %v648_v34 = vpack.c.bf16 %v580_v31, %v578_v29  ;;  %v585_v36 = vld [vmem:[%s1246_s1 + $0x278] sm:$0xff]  ;;  %v220_v37 = vld [vmem:[%s1246_s1 + $0x68] sm:$0xff]  ;;  %s1251_s15 = smov (!%p1030_p3, %s561_s15), 1 }
   0xf   : > { %709 = vmatpush1.bf16.msra.mxu0 %v708_v25  ;;  %647 = vmatprep.subr.bf16.mxu1 %v646_v26  ;;  %v712_v38 = vpack.c.bf16 %v217_v33, %v215_v32  ;;  %v650_v39 = vpack.c.bf16 %v585_v36, %v583_v35  ;;  %v222_v40 = vld [vmem:[%s1246_s1 + $0x78] sm:$0xff]  ;;  %v582_v41 = vld [vmem:[%s1246_s1 + $0x260] sm:$0xff]  ;;  %v584_v42 = vld [vmem:[%s1246_s1 + $0x270] sm:$0xff]  ;;  %s636_s28 = sshll.u32 %s1251_s15, 3 }
  0x10   : > { %711 = vmatprep.subr.bf16.mxu0 %v710_v30  ;;  %v714_v43 = vpack.c.bf16 %v222_v40, %v220_v37  ;;  %v219_v44 = vld [vmem:[%s1246_s1 + $0x60] sm:$0xff]  ;;  %v221_v45 = vld [vmem:[%s1246_s1 + $0x70] sm:$0xff]  ;;  %v587_v46 = vld [vmem:[%s1246_s1 + $0x288] sm:$0xff]  ;;  %v652_v50 = vpack.c.bf16 %v584_v42, %v582_v41  ;;  %s166_s21 = scalar_lea.vmem %s1245_s0, %s636_s28  ;;  %s171_s22 = scalar_lea.vmem %s1248_s3, %s636_s28 }
  0x11   : > { %v589_v47 = vld [vmem:[%s1246_s1 + $0x298] sm:$0xff]  ;;  %v224_v48 = vld [vmem:[%s1246_s1 + $0x88] sm:$0xff]  ;;  %v716_v51 = vpack.c.bf16 %v221_v45, %v219_v44  ;;  %v586_v53 = vld [vmem:[%s1246_s1 + $0x280] sm:$0xff] }
  0x12   : > { %v226_v49 = vld [vmem:[%s1246_s1 + $0x98] sm:$0xff]  ;;  %649 = vmatpush1.bf16.msra.mxu1 %v648_v34  ;;  %v654_v52 = vpack.c.bf16 %v589_v47, %v587_v46  ;;  %v588_v54 = vld [vmem:[%s1246_s1 + $0x290] sm:$0xff]  ;;  %v223_v55 = vld [vmem:[%s1246_s1 + $0x80] sm:$0xff] }
  0x13   : > { %713 = vmatpush1.bf16.msra.mxu0 %v712_v38  ;;  %651 = vmatprep.subr.bf16.mxu1 %v650_v39  ;;  %v718_v56 = vpack.c.bf16 %v226_v49, %v224_v48  ;;  %v225_v57 = vld [vmem:[%s1246_s1 + $0x90] sm:$0xff]  ;;  %v591_v58 = vld [vmem:[%s1246_s1 + $0x2a8] sm:$0xff]  ;;  %v593_v59 = vld [vmem:[%s1246_s1 + $0x2b8] sm:$0xff]  ;;  %v656_v62 = vpack.c.bf16 %v588_v54, %v586_v53 }
  0x14   : > { %715 = vmatprep.subr.bf16.mxu0 %v714_v43  ;;  %v228_v60 = vld [vmem:[%s1246_s1 + $0xa8] sm:$0xff]  ;;  %v230_v61 = vld [vmem:[%s1246_s1 + $0xb8] sm:$0xff]  ;;  %v720_v63 = vpack.c.bf16 %v225_v57, %v223_v55  ;;  %v658_v0 = vpack.c.bf16 %v593_v59, %v591_v58  ;;  %v590_v1 = vld [vmem:[%s1246_s1 + $0x2a0] sm:$0xff] }
  0x15   : > { %v592_v2 = vld [vmem:[%s1246_s1 + $0x2b0] sm:$0xff]  ;;  %v227_v3 = vld [vmem:[%s1246_s1 + $0xa0] sm:$0xff]  ;;  %v722_v4 = vpack.c.bf16 %v230_v61, %v228_v60  ;;  %v595_v6 = vld [vmem:[%s1246_s1 + $0x2c8] sm:$0xff] }
  0x16   : > { %653 = vmatpush1.bf16.msra.mxu1 %v652_v50  ;;  %v229_v5 = vld [vmem:[%s1246_s1 + $0xb0] sm:$0xff]  ;;  %v597_v7 = vld [vmem:[%s1246_s1 + $0x2d8] sm:$0xff]  ;;  %v232_v8 = vld [vmem:[%s1246_s1 + $0xc8] sm:$0xff]  ;;  %v660_v10 = vpack.c.bf16 %v592_v2, %v590_v1 }
  0x17   : > { %717 = vmatpush1.bf16.msra.mxu0 %v716_v51  ;;  %655 = vmatprep.subr.bf16.mxu1 %v654_v52  ;;  %v234_v9 = vld [vmem:[%s1246_s1 + $0xd8] sm:$0xff]  ;;  %v724_v11 = vpack.c.bf16 %v229_v5, %v227_v3  ;;  %v662_v12 = vpack.c.bf16 %v597_v7, %v595_v6  ;;  %v594_v13 = vld [vmem:[%s1246_s1 + $0x2c0] sm:$0xff]  ;;  %v596_v14 = vld [vmem:[%s1246_s1 + $0x2d0] sm:$0xff] }
  0x18   : > { %719 = vmatprep.subr.bf16.mxu0 %v718_v56  ;;  %v231_v15 = vld [vmem:[%s1246_s1 + $0xc0] sm:$0xff]  ;;  %v726_v16 = vpack.c.bf16 %v234_v9, %v232_v8  ;;  %v233_v17 = vld [vmem:[%s1246_s1 + $0xd0] sm:$0xff]  ;;  %v599_v18 = vld [vmem:[%s1246_s1 + $0x2e8] sm:$0xff]  ;;  %v664_v22 = vpack.c.bf16 %v596_v14, %v594_v13 }
  0x19   : > { %v601_v19 = vld [vmem:[%s1246_s1 + $0x2f8] sm:$0xff]  ;;  %v236_v20 = vld [vmem:[%s1246_s1 + $0xe8] sm:$0xff]  ;;  %v728_v23 = vpack.c.bf16 %v233_v17, %v231_v15  ;;  %v598_v25 = vld [vmem:[%s1246_s1 + $0x2e0] sm:$0xff] }
  0x1a   : > { %657 = vmatpush1.bf16.msra.mxu1 %v656_v62  ;;  %v238_v21 = vld [vmem:[%s1246_s1 + $0xf8] sm:$0xff]  ;;  %v666_v24 = vpack.c.bf16 %v601_v19, %v599_v18  ;;  %v600_v26 = vld [vmem:[%s1246_s1 + $0x2f0] sm:$0xff]  ;;  %v235_v27 = vld [vmem:[%s1246_s1 + $0xe0] sm:$0xff] }
  0x1b   : > { %721 = vmatpush1.bf16.msra.mxu0 %v720_v63  ;;  %659 = vmatprep.subr.bf16.mxu1 %v658_v0  ;;  %v730_v28 = vpack.c.bf16 %v238_v21, %v236_v20  ;;  %v237_v29 = vld [vmem:[%s1246_s1 + $0xf0] sm:$0xff]  ;;  %v603_v30 = vld [vmem:[%s1246_s1 + $0x308] sm:$0xff]  ;;  %v605_v31 = vld [vmem:[%s1246_s1 + $0x318] sm:$0xff]  ;;  %v668_v34 = vpack.c.bf16 %v600_v26, %v598_v25 }
  0x1c   : > { %723 = vmatprep.subr.bf16.mxu0 %v722_v4  ;;  %v240_v32 = vld [vmem:[%s1246_s1 + $0x108] sm:$0xff]  ;;  %v242_v33 = vld [vmem:[%s1246_s1 + $0x118] sm:$0xff]  ;;  %v732_v35 = vpack.c.bf16 %v237_v29, %v235_v27  ;;  %v670_v36 = vpack.c.bf16 %v605_v31, %v603_v30  ;;  %v602_v37 = vld [vmem:[%s1246_s1 + $0x300] sm:$0xff] }
  0x1d   : > { %v604_v38 = vld [vmem:[%s1246_s1 + $0x310] sm:$0xff]  ;;  %v239_v39 = vld [vmem:[%s1246_s1 + $0x100] sm:$0xff]  ;;  %v734_v40 = vpack.c.bf16 %v242_v33, %v240_v32  ;;  %v607_v42 = vld [vmem:[%s1246_s1 + $0x328] sm:$0xff] }
  0x1e   : > { %661 = vmatpush1.bf16.msra.mxu1 %v660_v10  ;;  %v241_v41 = vld [vmem:[%s1246_s1 + $0x110] sm:$0xff]  ;;  %v609_v43 = vld [vmem:[%s1246_s1 + $0x338] sm:$0xff]  ;;  %v244_v44 = vld [vmem:[%s1246_s1 + $0x128] sm:$0xff]  ;;  %v672_v46 = vpack.c.bf16 %v604_v38, %v602_v37 }
  0x1f   : > { %725 = vmatpush1.bf16.msra.mxu0 %v724_v11  ;;  %663 = vmatprep.subr.bf16.mxu1 %v662_v12  ;;  %v246_v45 = vld [vmem:[%s1246_s1 + $0x138] sm:$0xff]  ;;  %v736_v47 = vpack.c.bf16 %v241_v41, %v239_v39  ;;  %v674_v48 = vpack.c.bf16 %v609_v43, %v607_v42  ;;  %v606_v49 = vld [vmem:[%s1246_s1 + $0x320] sm:$0xff]  ;;  %v608_v50 = vld [vmem:[%s1246_s1 + $0x330] sm:$0xff] }
  0x20   : > { %727 = vmatprep.subr.bf16.mxu0 %v726_v16  ;;  %v243_v51 = vld [vmem:[%s1246_s1 + $0x120] sm:$0xff]  ;;  %v738_v52 = vpack.c.bf16 %v246_v45, %v244_v44  ;;  %v245_v53 = vld [vmem:[%s1246_s1 + $0x130] sm:$0xff]  ;;  %v611_v54 = vld [vmem:[%s1246_s1 + $0x348] sm:$0xff]  ;;  %v676_v58 = vpack.c.bf16 %v608_v50, %v606_v49 }
  0x21   : > { %v613_v55 = vld [vmem:[%s1246_s1 + $0x358] sm:$0xff]  ;;  %v248_v56 = vld [vmem:[%s1246_s1 + $0x148] sm:$0xff]  ;;  %v740_v59 = vpack.c.bf16 %v245_v53, %v243_v51  ;;  %v610_v61 = vld [vmem:[%s1246_s1 + $0x340] sm:$0xff] }
  0x22   : > { %665 = vmatpush1.bf16.msra.mxu1 %v664_v22  ;;  %v250_v57 = vld [vmem:[%s1246_s1 + $0x158] sm:$0xff]  ;;  %v678_v60 = vpack.c.bf16 %v613_v55, %v611_v54  ;;  %v612_v62 = vld [vmem:[%s1246_s1 + $0x350] sm:$0xff]  ;;  %v247_v63 = vld [vmem:[%s1246_s1 + $0x140] sm:$0xff] }
  0x23   : > { %729 = vmatpush1.bf16.msra.mxu0 %v728_v23  ;;  %667 = vmatprep.subr.bf16.mxu1 %v666_v24  ;;  %v742_v0 = vpack.c.bf16 %v250_v57, %v248_v56  ;;  %v249_v1 = vld [vmem:[%s1246_s1 + $0x150] sm:$0xff]  ;;  %v615_v2 = vld [vmem:[%s1246_s1 + $0x368] sm:$0xff]  ;;  %v617_v3 = vld [vmem:[%s1246_s1 + $0x378] sm:$0xff]  ;;  %v680_v6 = vpack.c.bf16 %v612_v62, %v610_v61 }
  0x24   : > { %731 = vmatprep.subr.bf16.mxu0 %v730_v28  ;;  %v252_v4 = vld [vmem:[%s1246_s1 + $0x168] sm:$0xff]  ;;  %v254_v5 = vld [vmem:[%s1246_s1 + $0x178] sm:$0xff]  ;;  %v614_v7 = vld [vmem:[%s1246_s1 + $0x360] sm:$0xff]  ;;  %v744_v8 = vpack.c.bf16 %v249_v1, %v247_v63  ;;  %v682_v9 = vpack.c.bf16 %v617_v3, %v615_v2 }
  0x25   : > { %v616_v10 = vld [vmem:[%s1246_s1 + $0x370] sm:$0xff]  ;;  %v251_v11 = vld [vmem:[%s1246_s1 + $0x160] sm:$0xff]  ;;  %v746_v13 = vpack.c.bf16 %v254_v5, %v252_v4  ;;  %v619_v14 = vld [vmem:[%s1246_s1 + $0x388] sm:$0xff] }
  0x26   : > { %669 = vmatpush1.bf16.msra.mxu1 %v668_v34  ;;  %v253_v12 = vld [vmem:[%s1246_s1 + $0x170] sm:$0xff]  ;;  %v621_v15 = vld [vmem:[%s1246_s1 + $0x398] sm:$0xff]  ;;  %v1136_v16 = vld [vmem:[%s166_s21] sm:$0xff]  ;;  %v684_v22 = vpack.c.bf16 %v616_v10, %v614_v7 }
  0x27   : > { %733 = vmatpush1.bf16.msra.mxu0 %v732_v35  ;;  %671 = vmatprep.subr.bf16.mxu1 %v670_v36  ;;  %v256_v17 = vld [vmem:[%s1246_s1 + $0x188] sm:$0xff]  ;;  %v258_v18 = vld [vmem:[%s1246_s1 + $0x198] sm:$0xff]  ;;  %v174_v19 = vcombine.high %v1136_v16, %v1136_v16  ;;  %v191_v20 = vsel %vm176_vm0, %v1136_v16, 0.0  ;;  %v177_v21 = vsel %vm176_vm0, %v1136_v16, -inf  ;;  %v618_v23 = vld [vmem:[%s1246_s1 + $0x380] sm:$0xff]  ;;  %v748_v27 = vpack.c.bf16 %v253_v12, %v251_v11 }
  0x28   : > { %735 = vmatprep.subr.bf16.mxu0 %v734_v40  ;;  %v620_v24 = vld [vmem:[%s1246_s1 + $0x390] sm:$0xff]  ;;  %v192_v25 = vrot.slane %v191_v20, 4  ;;  %v178_v26 = vrot.slane %v177_v21, 4  ;;  %v686_v28 = vpack.c.bf16 %v621_v15, %v619_v14  ;;  %v255_v29 = vld [vmem:[%s1246_s1 + $0x180] sm:$0xff]  ;;  %v750_v32 = vpack.c.bf16 %v258_v18, %v256_v17  ;;  %v623_v34 = vld [vmem:[%s1246_s1 + $0x3a8] sm:$0xff] }
  0x29   : > { %v198_v30 = vsel %vm176_vm0, %v174_v19, 0.0  ;;  %v184_v31 = vsel %vm176_vm0, %v174_v19, -inf  ;;  %v257_v33 = vld [vmem:[%s1246_s1 + $0x190] sm:$0xff]  ;;  %v625_v35 = vld [vmem:[%s1246_s1 + $0x3b8] sm:$0xff]  ;;  %v688_v39 = vpack.c.bf16 %v620_v24, %v618_v23  ;;  %v260_v40 = vld [vmem:[%s1246_s1 + $0x1a8] sm:$0xff] }
  0x2a   : > { %673 = vmatpush1.bf16.msra.mxu1 %v672_v46  ;;  %v199_v36 = vrot.slane %v198_v30, 4  ;;  %v185_v37 = vrot.slane %v184_v31, 4  ;;  %v193_v38 = vadd.f32 %v192_v25, %v191_v20  ;;  %v262_v41 = vld [vmem:[%s1246_s1 + $0x1b8] sm:$0xff]  ;;  %v179_v45 = vmax.f32 %v177_v21, %v178_v26  ;;  %v624_v49 = vld [vmem:[%s1246_s1 + $0x3b0] sm:$0xff]  ;;  %v259_v50 = vld [vmem:[%s1246_s1 + $0x1a0] sm:$0xff] }
  0x2b   : > { %737 = vmatpush1.bf16.msra.mxu0 %v736_v47  ;;  %675 = vmatprep.subr.bf16.mxu1 %v674_v48  ;;  %v752_v46 = vpack.c.bf16 %v257_v33, %v255_v29  ;;  %v690_v47 = vpack.c.bf16 %v625_v35, %v623_v34  ;;  %v622_v48 = vld [vmem:[%s1246_s1 + $0x3a0] sm:$0xff]  ;;  %v754_v51 = vpack.c.bf16 %v262_v41, %v260_v40  ;;  %v627_v53 = vld [vmem:[%s1246_s1 + $0x3c8] sm:$0xff]  ;;  %v629_v54 = vld [vmem:[%s1246_s1 + $0x3d8] sm:$0xff]  ;;  %v479_v35 = vstv %s478_s19 }
  0x2c   : > { %739 = vmatprep.subr.bf16.mxu0 %v738_v52  ;;  %v200_v42 = vadd.f32 %v199_v36, %v198_v30  ;;  %v186_v43 = vmax.f32 %v184_v31, %v185_v37  ;;  %v194_v44 = vrot.slane %v193_v38, 2  ;;  %v261_v52 = vld [vmem:[%s1246_s1 + $0x1b0] sm:$0xff]  ;;  %v264_v57 = vld [vmem:[%s1246_s1 + $0x1c8] sm:$0xff]  ;;  %v180_v63 = vrot.slane %v179_v45, 2  ;;  %v626_v2 = vld [vmem:[%s1246_s1 + $0x3c0] sm:$0xff] }
  0x2d   : > { %v694_v1 = vpack.c.bf16 %v629_v54, %v627_v53  ;;  %v628_v3 = vld [vmem:[%s1246_s1 + $0x3d0] sm:$0xff]  ;;  %v263_v4 = vld [vmem:[%s1246_s1 + $0x1c0] sm:$0xff]  ;;  %v631_v7 = vld [vmem:[%s1246_s1 + $0x3e8] sm:$0xff] }
  0x2e   : > { %677 = vmatpush1.bf16.msra.mxu1 %v676_v58  ;;  %v201_v55 = vrot.slane %v200_v42, 2  ;;  %v187_v56 = vrot.slane %v186_v43, 2  ;;  %v266_v58 = vld [vmem:[%s1246_s1 + $0x1d8] sm:$0xff]  ;;  %v268_v11 = vld [vmem:[%s1246_s1 + $0x1e8] sm:$0xff]  ;;  %v696_v14 = vpack.c.bf16 %v628_v3, %v626_v2  ;;  %v181_v18 = vmax.f32 %v179_v45, %v180_v63  ;;  %v630_v21 = vld [vmem:[%s1246_s1 + $0x3e0] sm:$0xff] }
  0x2f   : > { %741 = vmatpush1.bf16.msra.mxu0 %v740_v59  ;;  %679 = vmatprep.subr.bf16.mxu1 %v678_v60  ;;  %v195_v59 = vadd.f32 %v194_v44, %v193_v38  ;;  %v692_v60 = vpack.c.bf16 %v624_v49, %v622_v48  ;;  %v758_v5 = vpack.c.bf16 %v266_v58, %v264_v57  ;;  %v270_v12 = vld [vmem:[%s1246_s1 + $0x1f8] sm:$0xff]  ;;  %v267_v24 = vld [vmem:[%s1246_s1 + $0x1e0] sm:$0xff]  ;;  %v269_v25 = vld [vmem:[%s1246_s1 + $0x1f0] sm:$0xff]  ;;  %v492_v49 = vlaneseq }
  0x30   : > { %743 = vmatprep.subr.bf16.mxu0 %v742_v0  ;;  %v202_v61 = vadd.f32 %v201_v55, %v200_v42  ;;  %v188_v62 = vmax.f32 %v186_v43, %v187_v56  ;;  %v756_v0 = vpack.c.bf16 %v261_v52, %v259_v50  ;;  %v762_v23 = vpack.c.bf16 %v270_v12, %v268_v11 }
  0x31   : > { %v182_v29 = vrot.slane %v181_v18, 1  ;;  %v764_v30 = vpack.c.bf16 %v269_v25, %v267_v24 }
  0x32   : > { %681 = vmatpush1.bf16.msra.mxu1 %v680_v6  ;;  %v265_v6 = vld [vmem:[%s1246_s1 + $0x1d0] sm:$0xff]  ;;  %v189_v10 = vrot.slane %v188_v62, 1 }
  0x33   : > { %745 = vmatpush1.bf16.msra.mxu0 %v744_v8  ;;  %683 = vmatprep.subr.bf16.mxu1 %v682_v9  ;;  %v633_v8 = vld [vmem:[%s1246_s1 + $0x3f8] sm:$0xff]  ;;  %v203_v9 = vrot.slane %v202_v61, 1  ;;  %v760_v19 = vpack.c.bf16 %v265_v6, %v263_v4 }
  0x34   : > { %747 = vmatprep.subr.bf16.mxu0 %v746_v13  ;;  %v196_v13 = vrot.slane %v195_v59, 1  ;;  %v190_v17 = vmax.f32 %v188_v62, %v189_v10  ;;  %v698_v20 = vpack.c.bf16 %v633_v8, %v631_v7 }
  0x35   : > { %v204_v15 = vadd.f32 %v203_v9, %v202_v61 }
  0x36   : > { %685 = vmatpush1.bf16.msra.mxu1 %v684_v22  ;;  %v632_v22 = vld [vmem:[%s1246_s1 + $0x3f0] sm:$0xff]  ;;  %471 = vmatprep.mubr.f32.mxu0 %v190_v17 }
  0x37   : > { %749 = vmatpush1.bf16.msra.mxu0 %v748_v27  ;;  %687 = vmatprep.subr.bf16.mxu1 %v686_v28  ;;  %v206_v26 = vmul.f32 0.25, %v204_v15  ;;  %v197_v27 = vadd.f32 %v196_v13, %v195_v59  ;;  %v700_v28 = vpack.c.bf16 %v632_v22, %v630_v21 }
  0x38   : > { %751 = vmatprep.subr.bf16.mxu0 %v750_v32  ;;  %v183_v32 = vmax.f32 %v181_v18, %v182_v29 }
  0x39   : > { %400 = vmatprep.mubr.f32.mxu1 %v206_v26  ;;  %v205_v31 = vmul.f32 0.25, %v197_v27 }
  0x3a   : > { %689 = vmatpush1.bf16.msra.mxu1 %v688_v39 }
  0x3b   : > { %753 = vmatpush1.bf16.msra.mxu0 %v752_v46  ;;  %691 = vmatprep.subr.bf16.mxu1 %v690_v47 }
  0x3c   : > { %755 = vmatprep.subr.bf16.mxu0 %v754_v51  ;;  %v493_v51 = vshrl.u32 %v492_v49, 7 }
  0x3e   : > { %693 = vmatpush1.bf16.msra.mxu1 %v692_v60  ;;  %v494_v52 = vsub.s32 0, %v493_v51 }
  0x3f   : > { %757 = vmatpush1.bf16.msra.mxu0 %v756_v0  ;;  %695 = vmatprep.subr.bf16.mxu1 %v694_v1 }
  0x40   : > { %759 = vmatprep.subr.bf16.mxu0 %v758_v5 }
  0x42   : > { %697 = vmatpush1.bf16.msra.mxu1 %v696_v14 }
  0x43   : > { %761 = vmatpush1.bf16.msra.mxu0 %v760_v19  ;;  %699 = vmatprep.subr.bf16.mxu1 %v698_v20 }
  0x44   : > { %763 = vmatprep.subr.bf16.mxu0 %v762_v23 }
  0x46   : > { %701 = vmatpush1.bf16.msra.mxu1 %v700_v28 }
  0x47   : > { %765 = vmatpush1.bf16.msra.mxu0 %v764_v30 }
  0x49   : > { %401 = vmatmul.mubr.f32.vlgmr.msra.gmra.mrb[0].mxu1 %v205_v31 }
  0x4a   : > { %472 = vmatmul.mubr.f32.vlgmr.msra.gmra.mrb[0].mxu0 %v183_v32 }
 0x11c   : > { %v402_v33 = vpop.f32.mrb[0].mxu1 }
 0x11d   : > { %v473_v34 = vpop.f32.mrb[0].mxu0  ;;  %v404_v36 = vpop.f32.mrb[1].mxu1 }
 0x11e   : > { %v474_v37 = vadd.f32 %v473_v34, %v402_v33  ;;  %v475_v38 = vpop.f32.mrb[1].mxu0 }
 0x11f   : > { %v476_v39 = vadd.f32 %v475_v38, %v404_v36 }
 0x120   : > { %v480_v40 = vadd.f32 %v479_v35, %v474_v37 }
 0x121   : > { %v481_v41 = vadd.f32 %v479_v35, %v476_v39 }
 0x122   : > { %v482_v42 = vsub.f32 0.0, %v480_v40 }
 0x123   : > { %v483_v43 = vsub.f32 0.0, %v481_v41 }
 0x124   : > { %v484_v44 = vmul.f32 1.442695, %v482_v42 }
 0x125   : > { %v486_v45 = vmul.f32 1.442695, %v483_v43 }
 0x126   : > { %777 = vpow2.f32 %v484_v44 }
 0x127   : > { %779 = vpow2.f32 %v486_v45 }
 0x130   : > { %v778_v46 = vpop.eup %777 }
 0x131   : > { %v780_v47 = vpop.eup %779  ;;  %v488_v48 = vadd.f32 1.0, %v778_v46 }
 0x132   : > { %v489_v50 = vadd.f32 1.0, %v780_v47 }
 0x133   : > { %781 = vrcp.f32 %v488_v48 }
 0x134   : > { %783 = vrcp.f32 %v489_v50 }
 0x13d   : > { %v782_v53 = vpop.eup %781 }
 0x13e   : > { %v784_v54 = vpop.eup %783  ;;  %v495_v55 = vrot.slane %v782_v53, %v494_v52 }
 0x13f   : > { %v499_v56 = vrot.slane %v784_v54, %v494_v52 }
 0x141   : > { %v502_v57 = vcombine.low %v495_v55, %v499_v56 }
 0x143   : > { %v504_v58 = vmul.f32 %v502_v57, %v1136_v16 }
 0x145   : > { %505 = vst [vmem:[%s171_s22] sm:$0xff] %v504_v58 }
 0x146 PF: > { %s14_s14 = sadd.s32 1, %s791_s14  }
 0x147   : > { %p11_p4 = scmp.ge.s32.totalorder %s14_s14, 4  }
 0x149   :  { %13 = sbr.rel (!%p11_p4) target bundleno = 2 (0x2), region = 63 }

</bundles_post_ra>
